<compile_context>
chip_gen: v5e
topology: v5e:2x2
jax: 0.10.0
libtpu: 0.0.40
codegen_flags: <defaults>
</compile_context>

<pallas_src>
import functools

import jax
import jax.numpy as jnp
from jax.experimental import pallas as pl
from jax.experimental.pallas import tpu as pltpu


# ---------------------------------------------------------------------------
# Kernels
# ---------------------------------------------------------------------------

def se_kernel(x_ref, w1t_ref, b1_ref, w2t_ref, b2_ref, o_ref, *, hw_total):
    """Single-pass SE: pool + MLP + scale on a resident (Bn, C, HW) slab."""
    x = x_ref[...]                                              # native dtype

    # Squeeze: global average pool over the spatial (lane) axis, f32 accumulate.
    pooled = jnp.sum(x, axis=2, dtype=jnp.float32) * (1.0 / hw_total)  # (Bn, C)

    # Excitation MLP (1x1 convs on the pooled vector); weights pre-transposed.
    w1t = w1t_ref[...].astype(jnp.float32)                      # (C, R)
    b1 = b1_ref[...].astype(jnp.float32)                        # (1, R)
    h = jnp.dot(pooled, w1t, preferred_element_type=jnp.float32) + b1   # (Bn, R)
    h = h * jax.nn.sigmoid(h)                                   # SiLU

    w2t = w2t_ref[...].astype(jnp.float32)                      # (R, C)
    b2 = b2_ref[...].astype(jnp.float32)                        # (1, C)
    s = jnp.dot(h, w2t, preferred_element_type=jnp.float32) + b2        # (Bn, C)
    s = jax.nn.sigmoid(s)

    # Scale in the native dtype (gate rounded to x dtype once; numerically
    # negligible vs. an all-f32 reference, avoids an f32 slab temporary).
    o_ref[...] = x * s.astype(o_ref.dtype)[:, :, None]


def pool_mlp_kernel(x_ref, w1t_ref, b1_ref, w2t_ref, b2_ref, s_ref, acc_ref,
                    *, hw_total, hw_tile, needs_mask):
    """Pass 1 of the spill path: streamed pooling + gate MLP.

    Grid: (N, num_hw_tiles); HW is the (arbitrary) reduction axis.
    acc_ref: (1, C) f32 scratch holding the running spatial sum.
    s_ref:   (1, C, 1) f32 gate, written on the last HW tile.
    """
    hw_i = pl.program_id(1)

    @pl.when(hw_i == 0)
    def _():
        acc_ref[...] = jnp.zeros_like(acc_ref)

    x = x_ref[...]                                              # (1, C, hw_tile)
    if needs_mask:
        lane = jax.lax.broadcasted_iota(jnp.int32, x.shape, dimension=2)
        valid = (hw_i * hw_tile + lane) < hw_total
        x = jnp.where(valid, x, jnp.zeros_like(x))
    acc_ref[...] += jnp.sum(x, axis=2, dtype=jnp.float32)

    @pl.when(hw_i == pl.num_programs(1) - 1)
    def _():
        pooled = acc_ref[...] * (1.0 / hw_total)                # (1, C)
        w1t = w1t_ref[...].astype(jnp.float32)
        b1 = b1_ref[...].astype(jnp.float32)
        h = jnp.dot(pooled, w1t, preferred_element_type=jnp.float32) + b1
        h = h * jax.nn.sigmoid(h)
        w2t = w2t_ref[...].astype(jnp.float32)
        b2 = b2_ref[...].astype(jnp.float32)
        s = jax.nn.sigmoid(jnp.dot(h, w2t, preferred_element_type=jnp.float32) + b2)
        s_ref[...] = s[:, :, None]                              # (1, C, 1) f32


def scale_kernel(x_ref, s_ref, o_ref):
    """Pass 2 of the spill path: out = x * s, streamed over HW tiles."""
    o_ref[...] = x_ref[...] * s_ref[...].astype(o_ref.dtype)    # (1,C,t) * (1,C,1)


# ---------------------------------------------------------------------------
# Sizing helpers
# ---------------------------------------------------------------------------

def _vmem_limit_bytes():
    """Generation-aware scoped-VMEM limit (leave ~25% of physical headroom)."""
    cap = None
    try:
        info = pltpu.get_tpu_info()
        cap = getattr(info, "vmem_capacity_bytes", None)
    except Exception:
        cap = None
    if not cap:
        cap = 64 * 1024 * 1024          # conservative default (v7x per-TC VMEM)
    return min((cap * 3) // 4, 100 * 1024 * 1024)


def _sublane_packing(itemsize):
    # f32 -> 8 sublanes, bf16 -> 16, int8/fp8 -> 32.
    return max(1, 4 // itemsize) * 8


def _padded_slab_bytes(C, HW, dtype):
    """Bytes of one (C, HW) block after (sublane, lane) tile padding."""
    itemsize = jnp.dtype(dtype).itemsize
    packing = _sublane_packing(itemsize)
    c_pad = -(-C // packing) * packing
    hw_pad = -(-HW // 128) * 128
    return c_pad * hw_pad * itemsize


def _pick_batch_block(N, slab_bytes_padded, vmem_limit_bytes):
    """Largest divisor of N whose *padded* footprint fits the VMEM budget.

    Footprint per step ~= (in + out) * double-buffer * Bn * slab.  Prefer a Bn
    leaving >= 4 grid steps (>= 2 per v7x TensorCore, so next-block DMA can
    overlap previous-block writeback), then >= 2, then whatever fits.
    Returns 0 if even Bn = 1 does not fit (caller uses the two-pass path).
    """
    budget = (vmem_limit_bytes * 3) // 4      # keep room for weights/scratch
    max_bn = budget // (4 * slab_bytes_padded)
    if max_bn < 1:
        return 0
    divisors = [d for d in range(1, N + 1) if N % d == 0]
    fits = [d for d in divisors if d <= max_bn]
    for min_steps in (4, 2, 1):
        cands = [d for d in fits if N // d >= min_steps]
        if cands:
            return max(cands)
    return 0


def _const_spec(shape):
    """BlockSpec for a small operand fetched once (constant index map).

    Single-buffered via pipeline_mode=pl.Buffered(1) when supported; falls
    back to a default spec otherwise.
    """
    index_map = lambda *args: (0,) * len(shape)
    try:
        return pl.BlockSpec(shape, index_map, pipeline_mode=pl.Buffered(1))
    except Exception:
        return pl.BlockSpec(shape, index_map)


# ---------------------------------------------------------------------------
# Wrappers
# ---------------------------------------------------------------------------

def _se_single_pass(x, w1t, b1_2d, w2t, b2_2d, bn, vmem_limit):
    N, C, HW = x.shape
    R = w1t.shape[1]
    kernel = functools.partial(se_kernel, hw_total=HW)
    return pl.pallas_call(
        kernel,
        out_shape=jax.ShapeDtypeStruct((N, C, HW), x.dtype),
        grid_spec=pltpu.PrefetchScalarGridSpec(
            num_scalar_prefetch=0,
            grid=(N // bn,),
            in_specs=[
                pl.BlockSpec((bn, C, HW), lambda n: (n, 0, 0)),  # x slab
                _const_spec((C, R)),                             # w1^T
                _const_spec((1, R)),                             # b1
                _const_spec((R, C)),                             # w2^T
                _const_spec((1, C)),                             # b2
            ],
            out_specs=pl.BlockSpec((bn, C, HW), lambda n: (n, 0, 0)),
        ),
        compiler_params=pltpu.CompilerParams(
            dimension_semantics=("parallel",),
            vmem_limit_bytes=vmem_limit,
        ),
    )(x, w1t, b1_2d, w2t, b2_2d)


def _se_two_pass(x, w1t, b1_2d, w2t, b2_2d, vmem_limit, hw_tile_cap=None):
    """HW-streamed path for slabs that do not fit VMEM even at Bn = 1."""
    N, C, HW = x.shape
    R = w1t.shape[1]
    itemsize = jnp.dtype(x.dtype).itemsize
    packing = _sublane_packing(itemsize)
    c_pad = -(-C // packing) * packing
    hw_pad = -(-HW // 128) * 128

    # Size the HW tile against the tighter (pass-2) footprint:
    # x + out, each double-buffered.
    budget = (vmem_limit * 3) // 4
    max_tile = budget // (4 * c_pad * itemsize)
    hw_tile = max(128, (max_tile // 128) * 128)
    if hw_tile_cap is not None:
        hw_tile = min(hw_tile, max(128, (hw_tile_cap // 128) * 128))
    hw_tile = min(hw_tile, hw_pad)
    n_hw = pl.cdiv(HW, hw_tile)
    needs_mask = (HW % hw_tile) != 0

    # Pass 1: pooled sum over HW tiles (f32 scratch) + gate MLP on last tile.
    pool_kernel = functools.partial(
        pool_mlp_kernel, hw_total=HW, hw_tile=hw_tile, needs_mask=needs_mask)
    s = pl.pallas_call(
        pool_kernel,
        out_shape=jax.ShapeDtypeStruct((N, C, 1), jnp.float32),
        grid_spec=pltpu.PrefetchScalarGridSpec(
            num_scalar_prefetch=0,
            grid=(N, n_hw),
            in_specs=[
                pl.BlockSpec((1, C, hw_tile), lambda n, h: (n, 0, h)),
                _const_spec((C, R)),
                _const_spec((1, R)),
                _const_spec((R, C)),
                _const_spec((1, C)),
            ],
            out_specs=pl.BlockSpec((1, C, 1), lambda n, h: (n, 0, 0)),
            scratch_shapes=[pltpu.VMEM((1, C), jnp.float32)],
        ),
        compiler_params=pltpu.CompilerParams(
            dimension_semantics=("parallel", "arbitrary"),
            vmem_limit_bytes=vmem_limit,
        ),
    )(x, w1t, b1_2d, w2t, b2_2d)

    # Pass 2: apply the gate, streamed over HW tiles.
    out = pl.pallas_call(
        scale_kernel,
        out_shape=jax.ShapeDtypeStruct((N, C, HW), x.dtype),
        grid_spec=pltpu.PrefetchScalarGridSpec(
            num_scalar_prefetch=0,
            grid=(N, n_hw),
            in_specs=[
                pl.BlockSpec((1, C, hw_tile), lambda n, h: (n, 0, h)),
                pl.BlockSpec((1, C, 1), lambda n, h: (n, 0, 0)),
            ],
            out_specs=pl.BlockSpec((1, C, hw_tile), lambda n, h: (n, 0, h)),
        ),
        compiler_params=pltpu.CompilerParams(
            dimension_semantics=("parallel", "parallel"),
            vmem_limit_bytes=vmem_limit,
        ),
    )(x, s)
    return out


def squeeze_excitation(x_nchw, w1, b1, w2, b2, *,
                       force_two_pass=False, hw_tile_cap=None):
    """x_nchw: (N, C, H, W); w1: (R, C); b1: (R,); w2: (C, R); b2: (C,)."""
    N, C, H, W = x_nchw.shape
    R = w1.shape[0]
    HW = H * W
    x = x_nchw.reshape(N, C, HW)

    # Pre-transpose weights once in the wrapper (free layout plumbing) so the
    # kernel never transposes tiny unaligned tiles per grid step.
    w1t = jnp.transpose(w1)            # (C, R)
    w2t = jnp.transpose(w2)            # (R, C)
    b1_2d = b1.reshape(1, R)
    b2_2d = b2.reshape(1, C)

    vmem_limit = _vmem_limit_bytes()
    slab_padded = _padded_slab_bytes(C, HW, x.dtype)
    bn = 0 if force_two_pass else _pick_batch_block(N, slab_padded, vmem_limit)

    if bn == 0:
        out = _se_two_pass(x, w1t, b1_2d, w2t, b2_2d, vmem_limit,
                           hw_tile_cap=hw_tile_cap)
    else:
        out = _se_single_pass(x, w1t, b1_2d, w2t, b2_2d, bn, vmem_limit)
    return out.reshape(N, C, H, W)


def reference(x, w1, b1, w2, b2):
    pooled = jnp.mean(x, axis=(2, 3))                          # (N, C)
    h = pooled @ w1.T + b1
    h = h * jax.nn.sigmoid(h)
    s = jax.nn.sigmoid(h @ w2.T + b2)                          # (N, C)
    return x * s[:, :, None, None]


if __name__ == "__main__":
    key = jax.random.PRNGKey(0)
    N, C, H, W = 2, 4, 16, 16
    R = 2  # reduced_dim

    k_x, k_w1, k_b1, k_w2, k_b2 = jax.random.split(key, 5)
    x = jax.random.normal(k_x, (N, C, H, W), dtype=jnp.float32)
    # Deterministic synthetic parameters (shapes follow nn.Conv2d(k=1) weights).
    w1 = jax.random.normal(k_w1, (R, C), dtype=jnp.float32) * 0.5
    b1 = jax.random.normal(k_b1, (R,), dtype=jnp.float32) * 0.1
    w2 = jax.random.normal(k_w2, (C, R), dtype=jnp.float32) * 0.5
    b2 = jax.random.normal(k_b2, (C,), dtype=jnp.float32) * 0.1

    # Default (single-pass, VMEM-resident slab) path.
    out = jax.block_until_ready(squeeze_excitation(x, w1, b1, w2, b2))
    ref = reference(x, w1, b1, w2, b2)
    assert out.shape == (N, C, H, W)
    assert jnp.allclose(out, ref, atol=1e-5, rtol=1e-5), "single-pass mismatch"

    # Exercise the HW-streamed spill path too (non-multiple-of-128 spatial
    # extent forces the masked partial last tile and the cross-tile f32 sum).
    H2 = W2 = 15
    x2 = jax.random.normal(k_x, (N, C, H2, W2), dtype=jnp.float32)
    out2 = jax.block_until_ready(
        squeeze_excitation(x2, w1, b1, w2, b2,
                           force_two_pass=True, hw_tile_cap=128))
    ref2 = reference(x2, w1, b1, w2, b2)
    assert out2.shape == (N, C, H2, W2)
    assert jnp.allclose(out2, ref2, atol=1e-5, rtol=1e-5), "two-pass mismatch"

    print("KERNEL_OK")
</pallas_src>

<mosaic_0001>
module attributes {stable_mosaic.version = 11 : i64} {
  func.func @se_kernel(%arg0: i32, %arg1: memref<1x4x256xf32, #tpu.memory_space<vmem>>, %arg2: memref<4x2xf32, #tpu.memory_space<vmem>>, %arg3: memref<1x2xf32, #tpu.memory_space<vmem>>, %arg4: memref<2x4xf32, #tpu.memory_space<vmem>>, %arg5: memref<1x4xf32, #tpu.memory_space<vmem>>, %arg6: memref<1x4x256xf32, #tpu.memory_space<vmem>>) attributes {dimension_semantics = [#tpu.dimension_semantics<parallel>], iteration_bounds = array<i64: 2>, scalar_prefetch = 0 : i64, scratch_operands = 0 : i64, tpu.core_type = #tpu.core_type<tc>, window_params = [{transform_indices = @transform_0, window_bounds = array<i64: 1, 4, 256>}, {pipeline_mode = #tpu.pipeline_mode<synchronous>, transform_indices = @transform_1, window_bounds = array<i64: 4, 2>}, {pipeline_mode = #tpu.pipeline_mode<synchronous>, transform_indices = @transform_2, window_bounds = array<i64: 1, 2>}, {pipeline_mode = #tpu.pipeline_mode<synchronous>, transform_indices = @transform_3, window_bounds = array<i64: 2, 4>}, {pipeline_mode = #tpu.pipeline_mode<synchronous>, transform_indices = @transform_4, window_bounds = array<i64: 1, 4>}, {transform_indices = @transform_5, window_bounds = array<i64: 1, 4, 256>}]} {
    %c0 = arith.constant 0 : index
    %c0_0 = arith.constant 0 : index
    %c0_1 = arith.constant 0 : index
    %0 = vector.load %arg1[%c0, %c0_0, %c0_1] : memref<1x4x256xf32, #tpu.memory_space<vmem>>, vector<1x4x256xf32>
    %cst = arith.constant dense<0.000000e+00> : vector<1x4xf32>
    %1 = vector.multi_reduction <add>, %0, %cst [2] : vector<1x4x256xf32> to vector<1x4xf32>
    %cst_2 = arith.constant 3.906250e-03 : f32
    %2 = vector.broadcast %cst_2 : f32 to vector<1x4xf32>
    %3 = arith.mulf %1, %2 : vector<1x4xf32>
    %c0_3 = arith.constant 0 : index
    %c0_4 = arith.constant 0 : index
    %4 = vector.load %arg2[%c0_3, %c0_4] : memref<4x2xf32, #tpu.memory_space<vmem>>, vector<4x2xf32>
    %c0_5 = arith.constant 0 : index
    %c0_6 = arith.constant 0 : index
    %5 = vector.load %arg3[%c0_5, %c0_6] : memref<1x2xf32, #tpu.memory_space<vmem>>, vector<1x2xf32>
    %cst_7 = arith.constant dense<0.000000e+00> : vector<1x2xf32>
    %6 = tpu.matmul %3, %4, %cst_7 {dimension_numbers = #tpu.dot_dimension_numbers<[1], [0], [0], [1], [0, 0, 1, 1], [], []>} : vector<1x4xf32>, vector<4x2xf32>, vector<1x2xf32> -> vector<1x2xf32>
    %7 = arith.addf %6, %5 : vector<1x2xf32>
    %8 = arith.negf %7 : vector<1x2xf32>
    %9 = math.exp %8 : vector<1x2xf32>
    %cst_8 = arith.constant 1.000000e+00 : f32
    %10 = vector.broadcast %cst_8 : f32 to vector<1x2xf32>
    %11 = arith.addf %10, %9 : vector<1x2xf32>
    %12 = arith.divf %10, %11 : vector<1x2xf32>
    %13 = arith.mulf %7, %12 : vector<1x2xf32>
    %c0_9 = arith.constant 0 : index
    %c0_10 = arith.constant 0 : index
    %14 = vector.load %arg4[%c0_9, %c0_10] : memref<2x4xf32, #tpu.memory_space<vmem>>, vector<2x4xf32>
    %c0_11 = arith.constant 0 : index
    %c0_12 = arith.constant 0 : index
    %15 = vector.load %arg5[%c0_11, %c0_12] : memref<1x4xf32, #tpu.memory_space<vmem>>, vector<1x4xf32>
    %cst_13 = arith.constant dense<0.000000e+00> : vector<1x4xf32>
    %16 = tpu.matmul %13, %14, %cst_13 {dimension_numbers = #tpu.dot_dimension_numbers<[1], [0], [0], [1], [0, 0, 1, 1], [], []>} : vector<1x2xf32>, vector<2x4xf32>, vector<1x4xf32> -> vector<1x4xf32>
    %17 = arith.addf %16, %15 : vector<1x4xf32>
    %18 = arith.negf %17 : vector<1x4xf32>
    %19 = math.exp %18 : vector<1x4xf32>
    %cst_14 = arith.constant 1.000000e+00 : f32
    %20 = vector.broadcast %cst_14 : f32 to vector<1x4xf32>
    %21 = arith.addf %20, %19 : vector<1x4xf32>
    %22 = arith.divf %20, %21 : vector<1x4xf32>
    %23 = vector.shape_cast %22 : vector<1x4xf32> to vector<1x4x1xf32>
    %24 = vector.broadcast %23 : vector<1x4x1xf32> to vector<1x4x256xf32>
    %25 = arith.mulf %0, %24 : vector<1x4x256xf32>
    %c0_15 = arith.constant 0 : index
    %c0_16 = arith.constant 0 : index
    %c0_17 = arith.constant 0 : index
    %26 = vector.load %arg6[%c0_15, %c0_16, %c0_17] : memref<1x4x256xf32, #tpu.memory_space<vmem>>, vector<1x4x256xf32>
    tpu.vector_store %arg6[%c0_15, %c0_16, %c0_17], %25 {strides = array<i32>} : memref<1x4x256xf32, #tpu.memory_space<vmem>>, vector<1x4x256xf32>,
    return
  }
  func.func @transform_0(%arg0: i32) -> (i32, i32, i32) {
    %c0_i32 = arith.constant 0 : i32
    %c0_i32_0 = arith.constant 0 : i32
    %c0_i32_1 = arith.constant 0 : i32
    return %arg0, %c0_i32, %c0_i32_0 : i32, i32, i32
  }
  func.func @transform_1(%arg0: i32) -> (i32, i32) {
    %c0_i32 = arith.constant 0 : i32
    %c0_i32_0 = arith.constant 0 : i32
    %c0_i32_1 = arith.constant 0 : i32
    return %c0_i32, %c0_i32_0 : i32, i32
  }
  func.func @transform_2(%arg0: i32) -> (i32, i32) {
    %c0_i32 = arith.constant 0 : i32
    %c0_i32_0 = arith.constant 0 : i32
    %c0_i32_1 = arith.constant 0 : i32
    return %c0_i32, %c0_i32_0 : i32, i32
  }
  func.func @transform_3(%arg0: i32) -> (i32, i32) {
    %c0_i32 = arith.constant 0 : i32
    %c0_i32_0 = arith.constant 0 : i32
    %c0_i32_1 = arith.constant 0 : i32
    return %c0_i32, %c0_i32_0 : i32, i32
  }
  func.func @transform_4(%arg0: i32) -> (i32, i32) {
    %c0_i32 = arith.constant 0 : i32
    %c0_i32_0 = arith.constant 0 : i32
    %c0_i32_1 = arith.constant 0 : i32
    return %c0_i32, %c0_i32_0 : i32, i32
  }
  func.func @transform_5(%arg0: i32) -> (i32, i32, i32) {
    %c0_i32 = arith.constant 0 : i32
    %c0_i32_0 = arith.constant 0 : i32
    %c0_i32_1 = arith.constant 0 : i32
    return %arg0, %c0_i32, %c0_i32_0 : i32, i32, i32
  }
}

</mosaic_0001>

<bundles_post_ra>
// kernel: tpu_custom_call.1
= control target key start
LH: loop header
LB: loop body
LE: loop exit
PB: predicated region body
PF: predicated region fallthrough
CT: control target
= control target key end

     0   :  { %10 = vsyncpa [#allocation3], 0  ;;  %s814_s0 = inlined_call_operand.hbm [shape: f32[2,4,256], index: 0, kind: input, shape index: {}]   ;;  %s815_s1 = inlined_call_operand.vmem [shape: f32[4,2], index: 1, kind: input, shape index: {}]   ;;  %s816_s2 = inlined_call_operand.vmem [shape: f32[1,2], index: 2, kind: input, shape index: {}]   ;;  %s817_s3 = inlined_call_operand.vmem [shape: f32[2,4], index: 3, kind: input, shape index: {}]   ;;  %s818_s4 = inlined_call_operand.vmem [shape: f32[1,4], index: 4, kind: input, shape index: {}]   ;;  %s819_s5 = inlined_call_operand.hbm [shape: f32[2,4,256], index: 5, kind: output, shape index: {}]  }
   0x1   :  { %12 = vsyncpa [#allocation3 + $0x1], 0 }
   0x2   :  { %13 = vsyncpa [#allocation4], 0 }
   0x3   :  { %15 = vsyncpa [#allocation4 + $0x1], 0  ;;  %s667_s18 = smov 0   ;;  %s669_s19 = smov 0  }
   0x4   :  { %s671_s20 = smov 0   ;;  %s673_s21 = smov 0  }
   0x5 LB: > { %s688_s22 = sadd.s32 4294967295, %s634_s21   ;;  %s460_s23 = sadd.s32 4294967294, %s634_s21   ;;  %s634_s21 = sphi %s673_s21, %s829_s21   ;;  %s630_s20 = sphi %s671_s20, %s828_s20   ;;  %s626_s19 = sphi %s669_s19, %s827_s19   ;;  %s622_s18 = sphi %s667_s18, %s826_s18  }
   0x6   : > { %s692_s24 = sadd.s32 1, %s634_s21   ;;  %s28_s25 = sadd.s32 1, %s630_s20 }
   0x7   : > { %s25_s26 = ssub.s32 %s634_s21, %s692_s24  ;;  %p35_p0 = scmp.ne.s32.totalorder %s630_s20, %s626_s19 }
   0x8   : > { %p26_p1 = scmp.eq.s32.totalorder %s25_s26, 0  ;;  %p36_p2 = scmp.eq.s32.totalorder %s634_s21, 0 }
   0x9   : > { %p41_p3 = scmp.ne.s32.totalorder %s626_s19, %s622_s18  ;;  %p42_p4 = scmp.eq.s32.totalorder %s688_s22, 0 }
   0xa   : > { %s704_s27 = scalar_select %p26_p1, %s630_s20, %s28_s25  }
   0xb   : > { %p706_p5 = por %p36_p2, %p35_p0  ;;  %p710_p6 = por %p42_p4, %p41_p3 }
   0xc   : > { %p149_p7 = scmp.eq.s32.totalorder %s688_s22, 1  ;;  %p155_p8 = scmp.eq.s32.totalorder %s460_s23, 1 }
   0xd   : > { %p494_p10 = scmp.lt.s32.totalorder %s634_s21, 2  ;;  %s187_s7 = sand.u32 1, %s630_s20  }
   0xe   : > { %p717_p11 = por %p149_p7, %p35_p0  ;;  %p721_p12 = por %p155_p8, %p41_p3 }
   0xf   : > { %s480_s8 = sshll.u32 %s634_s21, 3  ;;  %s463_s9 = sshll.u32 %s187_s7, 3 }
  0x10   : > { %s196_s12 = scalar_lea.hbm %s814_s0, %s480_s8  ;;  %s191_s14 = scalar_lea.vmem [#allocation2], %s463_s9 }
  0x11   : > { %s198_s13 = sshll.u32 %s196_s12, 4  ;;  %s200_s15 = sshll.u32 %s191_s14, 4  ;;  %s199_s13 = int_to_ptr.hbm [resolvable:$true] %s198_s13  ;;  %s201_s15 = int_to_ptr.vmem [resolvable:$true] %s200_s15 }
  0x12   : > { %p732_p13 = pnand %p494_p10, %p706_p5  ;;  %p466_p0 = scmp.ge.s32.totalorder %s634_s21, 1 }
  0x13   : > { %p205_p1 = scmp.lt.s32.totalorder %s634_s21, 3  ;;  %s188_s17 = scalar_lea.sflag [#allocation3], %s187_s7 }
  0x14   : > { %s538_s23 = sshra.s32 %s199_s13, 4  ;;  %p542_p3 = pneg %p732_p13  ;;  %s539_s23 = int_to_ptr.hbm [resolvable:$true] %s538_s23 }
  0x15   : > { %s540_s25 = scalar_lea.hbm %s539_s23, 8  ;;  %s545_s28 = scalar_lea.hbm %s814_s0, 16 }
  0x16   : > { %p541_p2 = scmp.ne.s32.totalorder %s539_s23, %s540_s25  ;;  %p546_p5 = scmp.lt.s32.totalorder %s539_s23, %s814_s0 }
  0x17   : > { %p547_p8 = scmp.lt.s32.totalorder %s545_s28, %s540_s25 }
  0x18   : > { %p543_p4 = pnand %p542_p3, %p541_p2 }
  0x19   : > { %p548_p10 = por %p547_p8, %p546_p5 }
  0x1a   : > { %p544_p7 = pneg %p543_p4 }
  0x1c   : > { %p549_p9 = pnand %p548_p10, %p544_p7 }
  0x1e   : > { %552 = shalt.err (!%p549_p9)
}
  0x1f   : > { %489 = dma.hbm_to_vmem [thread:$0]  (!%p732_p13), %s199_s13, 128, %s201_s15, %s188_s17  }
  0x20   : > { %p206_p2 = pnand %p466_p0, %p205_p1 }
  0x21   : > { %s753_s7 = sand.u32 (!%p206_p2), 1, %s626_s19  }
  0x22   : > { %209 = sbr.rel (%p206_p2) target bundleno = 610 (0x262), region = 40  ;;  %s467_s11 = sshll.u32 (!%p206_p2), %s753_s7, 3 }
  0x23   : > { %s212_s12 = scalar_lea.sflag (!%p206_p2), [#allocation3], %s753_s7  ;;  %s215_s14 = scalar_lea.vmem (!%p206_p2), [#allocation2], %s467_s11 }
  0x27   : > { %613 = dma.done.wait (%p710_p6), %s212_s12, 128  }
  0x28   : > { %615 = vsyncadd (%p710_p6), %s212_s12, 4294967168  ;;  %v763_v0 = vld [vmem:[%s215_s14] sm:$0xff]  ;;  %vm250_vm0 = vcmask 1043456   ;;  %v257_v6 = vld [vmem:[%s815_s1] sm:$0xf]  ;;  %v260_v7 = vlaneseq  ;;  %vm263_vm1 = vcmask 31744  }
  0x29   : > { %245 = vst [vmem:[#allocation1] ss:$2 sm:$0xff] %v763_v0  ;;  %469 = vmatpush.msk.msra.mxu0 %vm250_vm0, %v257_v6  ;;  %v258_v12 = vld [vmem:[%s816_s2] sm:$0x1]  ;;  %vm315_vm2 = vcmask 1041408   ;;  %vm311_vm7 = vcmask 15360  }
  0x2a   : > { %v261_v8 = vand.u32 127, %v260_v7  ;;  %v309_v13 = vld [vmem:[%s817_s3] sm:$0x3]  ;;  %v360_v30 = vshrl.u32 %v260_v7, 7  ;;  %v636_v48 = vmov 839922192  }
  0x2b   : > { %472 = vmatpush.msk.msra.mxu1 %vm315_vm2, %v309_v13  ;;  %v310_v31 = vld [vmem:[%s818_s4] sm:$0x1]  ;;  %v367_v49 = vunpack.c.l.s4 %v636_v48  ;;  %s481_s8 = sshll.u32 %s688_s22, 3  ;;  %s242_s12 = scalar_lea.vmem [#allocation5], %s467_s11 }
  0x2c   : > { %529 = vset.pattern.permute.xlu0 %v360_v30  ;;  %s385_s10 = scalar_lea.hbm %s819_s5, %s481_s8  ;;  %s387_s14 = sshll.u32 %s242_s12, 4  ;;  %s388_s14 = int_to_ptr.vmem [resolvable:$true] %s387_s14 }
  0x2d   : > { %v368_v50 = vunpack.c.0.s8 %v367_v49  ;;  %s389_s13 = sshll.u32 %s385_s10, 4  ;;  %s374_s15 = scalar_lea.sflag [#allocation4], %s753_s7  ;;  %s390_s13 = int_to_ptr.hbm [resolvable:$true] %s389_s13 }
  0x2e   : > { %s582_s29 = sshra.s32 %s390_s13, 4  ;;  %s588_s11 = scalar_lea.hbm %s819_s5, 16  ;;  %s583_s29 = int_to_ptr.hbm [resolvable:$true] %s582_s29 }
  0x2f   : > { %s584_s22 = scalar_lea.hbm %s583_s29, 8  ;;  %p589_p0 = scmp.lt.s32.totalorder %s583_s29, %s819_s5 }
  0x30   : > { %v246_v1 = vld.sshfl [vmem:[#allocation1] sm:$0xff pattern:$0x75316420]  ;;  %v247_v2 = vld.sshfl [vmem:[#allocation1 + $0x8] sm:$0xff pattern:$0x75316420]  ;;  %p585_p6 = scmp.ne.s32.totalorder %s583_s29, %s584_s22  ;;  %p590_p1 = scmp.lt.s32.totalorder %s588_s11, %s584_s22 }
  0x31   : > { %v251_v3 = vsel %vm250_vm0, %v246_v1, 0.0  ;;  %v252_v4 = vsel %vm250_vm0, %v247_v2, 0.0 }
  0x32   : > { %v253_v5 = vadd.f32 %v252_v4, %v251_v3  ;;  %p586_p9 = pnand %p585_p6, %p717_p11  ;;  %p591_p3 = por %p590_p1, %p589_p0 }
  0x34   : > { %254 = vadd.xlane.f32.xlu0 %v253_v5  ;;  %p587_p13 = pneg %p586_p9 }
  0x36   : > { %p592_p4 = pnand %p591_p3, %p587_p13 }
  0xa7   : > { %v255_v9 = vpop.xlane.xlu0 %254 }
  0xa8   : > { %v256_v10 = vmul.f32 0.00390625, %v255_v9 }
  0xaa   : > { %v262_v11 = vperm.slane %v256_v10, %v261_v8 }
  0xac   : > { %470 = vmatmul.msk.f32.vlgmr.msra.gmra.mxu0 %vm263_vm1, %v262_v11 }
 0x129   : > { %v286_v14 = vpop.f32.mrf.mxu0 }
 0x12a   : > { %v287_v15 = vadd.f32 %v286_v14, %v258_v12 }
 0x12c   : > { %v471_v16 = vmul.f32 -1.442695, %v287_v15 }
 0x12e   : > { %530 = vpow2.f32 %v471_v16 }
 0x134   : > { %v531_v17 = vpop.eup %530 }
 0x135   : > { %v292_v18 = vadd.f32 1.0, %v531_v17 }
 0x137   : > { %532 = vrcp.f32 %v292_v18  ;;  %v304_v22 = vand.u32 2147483648, %v292_v18  ;;  %v302_v24 = vand.u32 2147483647, %v292_v18  ;;  %vm298_vm4 = vweird.f32 %v292_v18 }
 0x139   : > { %v305_v26 = vor.u32 1.1754944e-38, %v304_v22  ;;  %vm303_vm6 = vcmp.eq.f32.partialorder %v302_v24, 8.507059e+37 }
 0x13d   : > { %v533_v19 = vpop.eup %532 }
 0x13e   : > { %v294_v20 = vmul.f32 %v533_v19, %v292_v18  ;;  %vm299_vm3 = vweird.f32 %v533_v19 }
 0x13f   : > { %vm300_vm5 = vmor %vm298_vm4, %vm299_vm3 }
 0x140   : > { %v295_v21 = vsub.f32 1.0, %v294_v20 }
 0x142   : > { %v296_v23 = vmul.f32 %v533_v19, %v295_v21 }
 0x144   : > { %v297_v25 = vadd.f32 %v533_v19, %v296_v23 }
 0x146   : > { %v301_v27 = vsel %vm300_vm5, %v533_v19, %v297_v25 }
 0x147   : > { %v306_v28 = vsel %vm303_vm6, %v305_v26, %v301_v27 }
 0x148   : > { %v308_v29 = vmul.f32 %v306_v28, %v287_v15 }
 0x14a   : > { %473 = vmatmul.msk.f32.vlgmr.msra.gmra.mxu1 %vm311_vm7, %v308_v29 }
 0x1c7   : > { %v336_v32 = vpop.f32.mrf.mxu1 }
 0x1c8   : > { %v337_v33 = vadd.f32 %v336_v32, %v310_v31 }
 0x1ca   : > { %v474_v34 = vmul.f32 -1.442695, %v337_v33 }
 0x1cc   : > { %534 = vpow2.f32 %v474_v34 }
 0x1d2   : > { %v535_v35 = vpop.eup %534 }
 0x1d3   : > { %v342_v36 = vadd.f32 1.0, %v535_v35 }
 0x1d5   : > { %536 = vrcp.f32 %v342_v36  ;;  %v354_v40 = vand.u32 2147483648, %v342_v36  ;;  %v352_v42 = vand.u32 2147483647, %v342_v36  ;;  %vm348_vm9 = vweird.f32 %v342_v36 }
 0x1d7   : > { %v355_v44 = vor.u32 1.1754944e-38, %v354_v40  ;;  %vm353_vm11 = vcmp.eq.f32.partialorder %v352_v42, 8.507059e+37 }
 0x1db   : > { %v537_v37 = vpop.eup %536 }
 0x1dc   : > { %v344_v38 = vmul.f32 %v537_v37, %v342_v36  ;;  %vm349_vm8 = vweird.f32 %v537_v37 }
 0x1dd   : > { %vm350_vm10 = vmor %vm348_vm9, %vm349_vm8 }
 0x1de   : > { %v345_v39 = vsub.f32 1.0, %v344_v38 }
 0x1e0   : > { %v346_v41 = vmul.f32 %v537_v37, %v345_v39 }
 0x1e2   : > { %v347_v43 = vadd.f32 %v537_v37, %v346_v41 }
 0x1e4   : > { %v351_v45 = vsel %vm350_vm10, %v537_v37, %v347_v43 }
 0x1e5   : > { %v356_v46 = vsel %vm353_vm11, %v355_v44, %v351_v45 }
 0x1e6   : > { %v358_v47 = vperm.slane %v356_v46, 0 }
 0x1e8   : > { %363 = vperm.xlu0 %529, %v358_v47  }
 0x25a   : > { %v364_v51 = vpop.permute.xlu0 %363 }
 0x25b   : > { %v369_v52 = vperm.slane %v364_v51, %v368_v50 }
 0x25d   : > { %v371_v53 = vmul.f32 %v369_v52, %v763_v0 }
 0x25f   : > { %372 = vst [vmem:[%s242_s12] sm:$0xff] %v371_v53 }
 0x260   : > { %595 = shalt.err (!%p592_p4)
}
 0x261   : > { %484 = dma.vmem_to_hbm [thread:$0]  (%p717_p11), %s388_s14, 128, %s390_s13, %s374_s15  }
 0x262 PF: > { %s401_s7 = sand.u32 1, %s622_s18   ;;  %p825_p7 = scmp.ge.s32.totalorder %s634_s21, 2 }
 0x263   : > { %s402_s26 = scalar_lea.sflag [#allocation4], %s401_s7 }
 0x264   : > { %p491_p5 = pnand %p825_p7, %p721_p12 }
 0x266   : > { %p492_p8 = pneg %p491_p5 }
 0x268   : > { %617 = dma.done.wait (%p492_p8), %s402_s26, 128  }
 0x269   : > { %619 = vsyncadd (%p492_p8), %s402_s26, 4294967168  ;;  %p18_p10 = scmp.ge.s32.totalorder %s692_s24, 4   ;;  %s826_s18 = smov %s626_s19 }
 0x26a   : > { %s827_s19 = smov %s630_s20  ;;  %s828_s20 = smov %s704_s27 }
 0x26b   : > { %s829_s21 = smov %s692_s24  ;;  %20 = sbr.rel (!%p18_p10) target bundleno = 5 (0x5), region = 85 }
 0x270   :  { %408 = vsyncpa [#allocation3], 1 }
 0x271   :  { %410 = vsyncpa [#allocation3 + $0x1], 1 }
 0x272   :  { %411 = vsyncpa [#allocation4], 1 }
 0x273   :  { %413 = vsyncpa [#allocation4 + $0x1], 1 }

</bundles_post_ra>
